<compile_context>
chip_gen: v5e
topology: v5e:2x2
jax: 0.10.0
libtpu: 0.0.40
codegen_flags: <defaults>
</compile_context>

<pallas_src>
import functools

import jax
import jax.numpy as jnp
from jax.experimental import pallas as pl
from jax.experimental.pallas import tpu as pltpu


def _round_up(x, m):
    return (x + m - 1) // m * m


def deepcrossing_kernel(emb_ref, w1_ref, b1_ref, wf_ref, wf2_ref, c_ref, o_ref):
    # emb_ref: (TB, D) bf16        w1_ref: (D, D) bf16
    # b1_ref / wf_ref / wf2_ref: (1, D) f32
    # c_ref:   (1, 1) f32 in SMEM  o_ref:  (TB, 1) f32
    x = emb_ref[...]                                   # bf16 tile, no f32 copy

    # fc1 -> relu : the single remaining MXU matmul (f32 accumulation).
    h = jnp.dot(x, w1_ref[...], preferred_element_type=jnp.float32) + b1_ref[...]
    h = jnp.maximum(h, 0.0)

    # Folded head: logit = x@wf + relu(x@W1+b1)@(W2@wf) + (b2@wf + bf)
    # as a VPU multiply-add + lane reduction (XLU); bf16*f32 promotes to f32.
    contrib = x * wf_ref[...] + h * wf2_ref[...]       # (TB, D) f32
    logit = jnp.sum(contrib, axis=-1, keepdims=True) + c_ref[0, 0]
    o_ref[...] = jax.nn.sigmoid(logit).astype(o_ref.dtype)


@functools.partial(jax.jit, static_argnames=("tb",))
def deep_crossing_forward(x_idx, params, tb=4096):
    """x_idx: (B, F) int32 categorical indices. Returns (B, 1) float32."""
    B, F = x_idx.shape
    E = params["emb_table"].shape[1]
    D = F * E

    # ---- batch tiling (static Python ints) ----
    Bp8 = _round_up(B, 8)
    num_tiles = pl.cdiv(Bp8, min(tb, Bp8))
    if Bp8 >= 2048:
        # Ensure >=2 grid steps once the batch is big enough: keeps both
        # TensorCores busy on v7x; harmless on single-TC v5e/v6e.
        num_tiles = max(num_tiles, 2)
    TB = _round_up(pl.cdiv(Bp8, num_tiles), 8)   # near-even split, 8-aligned
    Bp = TB * num_tiles

    # Pad the *tiny* index array (not the big activation) so the gather
    # writes the padded (Bp, D) buffer directly -- no extra HBM copy.
    if Bp != B:
        x_idx = jnp.pad(x_idx, ((0, Bp - B), (0, 0)))   # index 0 stays valid

    # FeatureEmbedding lookup (plain-JAX gather) straight to bf16: table is
    # stored bf16 so the gather reads half the bytes and needs no cast pass.
    emb = jnp.take(params["emb_table"], x_idx + params["offsets"][None, :], axis=0)
    emb = emb.reshape(Bp, D)                            # (Bp, D) bf16

    # Host-side weight prep (tiny): bf16 W1 for the MXU, fold W2/b2/bf into
    # the final projection.
    w1 = params["w1"].astype(jnp.bfloat16)              # (D, D) bf16
    b1 = params["b1"]                                   # (1, D) f32
    wf_col = params["wf"]                               # (D, 1) f32
    wf = wf_col.reshape(1, D)                           # (1, D) f32
    wf2 = (params["w2"] @ wf_col).reshape(1, D)         # (1, D) f32 = (W2 @ wf)^T
    c = params["b2"] @ wf_col + params["bf"]            # (1, 1) f32 -> SMEM

    out = pl.pallas_call(
        deepcrossing_kernel,
        out_shape=jax.ShapeDtypeStruct((Bp, 1), jnp.float32),
        grid=(num_tiles,),
        in_specs=[
            pl.BlockSpec((TB, D), lambda i: (i, 0)),            # emb tile (streams)
            pl.BlockSpec((D, D), lambda i: (0, 0)),             # w1  (resident)
            pl.BlockSpec((1, D), lambda i: (0, 0)),             # b1  (resident)
            pl.BlockSpec((1, D), lambda i: (0, 0)),             # wf  (resident)
            pl.BlockSpec((1, D), lambda i: (0, 0)),             # wf2 (resident)
            pl.BlockSpec(memory_space=pltpu.MemorySpace.SMEM),  # folded scalar c
        ],
        out_specs=pl.BlockSpec((TB, 1), lambda i: (i, 0)),
        compiler_params=pltpu.CompilerParams(
            dimension_semantics=("parallel",),
            vmem_limit_bytes=32 * 1024 * 1024,
        ),
    )(emb, w1, b1, wf, wf2, c)
    return out[:B]


def init_params(key, feature_nums, emb_dims):
    F = len(feature_nums)
    D = F * emb_dims
    total = sum(feature_nums)
    keys = jax.random.split(key, 6)
    params = {
        # Embedding table stored bf16: halves gather HBM traffic and feeds the
        # kernel's bf16 activation path directly.
        "emb_table": (jax.random.normal(keys[0], (total, emb_dims), jnp.float32)
                      * 0.1).astype(jnp.bfloat16),
        "offsets": jnp.array([0] + list(jnp.cumsum(jnp.array(feature_nums))[:-1]),
                             dtype=jnp.int32),
        # ResidualUnit fc1 / fc2 (stored as (in, out), biases as (1, D))
        "w1": jax.random.normal(keys[1], (D, D), jnp.float32) * (1.0 / jnp.sqrt(D)),
        "b1": jax.random.normal(keys[2], (1, D), jnp.float32) * 0.01,
        "w2": jax.random.normal(keys[3], (D, D), jnp.float32) * (1.0 / jnp.sqrt(D)),
        "b2": jax.random.normal(keys[4], (1, D), jnp.float32) * 0.01,
        # Final Linear(D, 1)
        "wf": jax.random.normal(keys[5], (D, 1), jnp.float32) * (1.0 / jnp.sqrt(D)),
        "bf": jnp.zeros((1, 1), jnp.float32),
    }
    return params


def reference_forward(x_idx, params):
    """Pure-JAX f32 reference mirroring the PyTorch module semantics."""
    emb = jnp.take(params["emb_table"], x_idx + params["offsets"][None, :], axis=0)
    x = emb.reshape(x_idx.shape[0], -1).astype(jnp.float32)
    h = x @ params["w1"] + params["b1"]
    h = jnp.maximum(h, 0.0)
    h = h @ params["w2"] + params["b2"]
    r = x + h
    logit = r @ params["wf"] + params["bf"]
    return jax.nn.sigmoid(logit)


if __name__ == "__main__":
    # Small, deterministic configuration: 4 feature fields, 32-dim embeddings
    # -> hidden size D = 128 (lane-aligned), batch = 8 (sublane-aligned).
    feature_nums = [10, 20, 30, 40]
    emb_dims = 32
    B = 8

    key = jax.random.PRNGKey(0)
    pkey, xkey = jax.random.split(key)
    params = init_params(pkey, feature_nums, emb_dims)

    # categorical inputs: one index per field, within that field's cardinality
    cols = []
    xkeys = jax.random.split(xkey, len(feature_nums))
    for i, n in enumerate(feature_nums):
        cols.append(jax.random.randint(xkeys[i], (B,), 0, n, dtype=jnp.int32))
    x_idx = jnp.stack(cols, axis=1)   # (B, F) int32

    out = deep_crossing_forward(x_idx, params)
    out = jax.block_until_ready(out)

    ref = reference_forward(x_idx, params)
    assert out.shape == (B, 1)
    # bf16 table + bf16 MXU inputs (f32 accumulate) and folded-W2 accumulation
    # order -> compare to the f32 reference with a relaxed tolerance.
    assert jnp.allclose(out, ref, atol=5e-3, rtol=5e-3), (
        f"max abs err {jnp.max(jnp.abs(out - ref))}")

    print("KERNEL_OK")
</pallas_src>

<mosaic_0001>
module attributes {stable_mosaic.version = 11 : i64} {
  func.func @deepcrossing_kernel(%arg0: i32, %arg1: memref<8x128xbf16, #tpu.memory_space<vmem>>, %arg2: memref<128x128xbf16, #tpu.memory_space<vmem>>, %arg3: memref<1x128xf32, #tpu.memory_space<vmem>>, %arg4: memref<1x128xf32, #tpu.memory_space<vmem>>, %arg5: memref<1x128xf32, #tpu.memory_space<vmem>>, %arg6: memref<1x1xf32, #tpu.memory_space<smem>>, %arg7: memref<8x1xf32, #tpu.memory_space<vmem>>) attributes {dimension_semantics = [#tpu.dimension_semantics<parallel>], iteration_bounds = array<i64: 1>, scalar_prefetch = 0 : i64, scratch_operands = 0 : i64, tpu.core_type = #tpu.core_type<tc>, window_params = [{transform_indices = @transform_0, window_bounds = array<i64: 8, 128>}, {pipeline_mode = #tpu.pipeline_mode<synchronous>, transform_indices = @transform_1, window_bounds = array<i64: 128, 128>}, {pipeline_mode = #tpu.pipeline_mode<synchronous>, transform_indices = @transform_2, window_bounds = array<i64: 1, 128>}, {pipeline_mode = #tpu.pipeline_mode<synchronous>, transform_indices = @transform_3, window_bounds = array<i64: 1, 128>}, {pipeline_mode = #tpu.pipeline_mode<synchronous>, transform_indices = @transform_4, window_bounds = array<i64: 1, 128>}, {transform_indices = @transform_5, window_bounds = array<i64: 1, 1>}, {transform_indices = @transform_6, window_bounds = array<i64: 8, 1>}]} {
    %c0 = arith.constant 0 : index
    %c0_0 = arith.constant 0 : index
    %0 = vector.load %arg1[%c0, %c0_0] : memref<8x128xbf16, #tpu.memory_space<vmem>>, vector<8x128xbf16>
    %c0_1 = arith.constant 0 : index
    %c0_2 = arith.constant 0 : index
    %1 = vector.load %arg2[%c0_1, %c0_2] : memref<128x128xbf16, #tpu.memory_space<vmem>>, vector<128x128xbf16>
    %cst = arith.constant dense<0.000000e+00> : vector<8x128xf32>
    %2 = tpu.matmul %0, %1, %cst {dimension_numbers = #tpu.dot_dimension_numbers<[1], [0], [0], [1], [0, 0, 1, 1], [], []>} : vector<8x128xbf16>, vector<128x128xbf16>, vector<8x128xf32> -> vector<8x128xf32>
    %c0_3 = arith.constant 0 : index
    %c0_4 = arith.constant 0 : index
    %3 = vector.load %arg3[%c0_3, %c0_4] : memref<1x128xf32, #tpu.memory_space<vmem>>, vector<1x128xf32>
    %4 = vector.broadcast %3 : vector<1x128xf32> to vector<8x128xf32>
    %5 = arith.addf %2, %4 : vector<8x128xf32>
    %cst_5 = arith.constant 0.000000e+00 : f32
    %6 = vector.broadcast %cst_5 : f32 to vector<8x128xf32>
    %7 = arith.maximumf %5, %6 : vector<8x128xf32>
    %c0_6 = arith.constant 0 : index
    %c0_7 = arith.constant 0 : index
    %8 = vector.load %arg4[%c0_6, %c0_7] : memref<1x128xf32, #tpu.memory_space<vmem>>, vector<1x128xf32>
    %9 = arith.extf %0 : vector<8x128xbf16> to vector<8x128xf32>
    %10 = vector.broadcast %8 : vector<1x128xf32> to vector<8x128xf32>
    %11 = arith.mulf %9, %10 : vector<8x128xf32>
    %c0_8 = arith.constant 0 : index
    %c0_9 = arith.constant 0 : index
    %12 = vector.load %arg5[%c0_8, %c0_9] : memref<1x128xf32, #tpu.memory_space<vmem>>, vector<1x128xf32>
    %13 = vector.broadcast %12 : vector<1x128xf32> to vector<8x128xf32>
    %14 = arith.mulf %7, %13 : vector<8x128xf32>
    %15 = arith.addf %11, %14 : vector<8x128xf32>
    %cst_10 = arith.constant dense<0.000000e+00> : vector<8xf32>
    %16 = vector.multi_reduction <add>, %15, %cst_10 [1] : vector<8x128xf32> to vector<8xf32>
    %17 = vector.shape_cast %16 : vector<8xf32> to vector<8x1xf32>
    %c0_11 = arith.constant 0 : index
    %c0_12 = arith.constant 0 : index
    %18 = memref.load %arg6[%c0_11, %c0_12] : memref<1x1xf32, #tpu.memory_space<smem>>
    %19 = vector.broadcast %18 : f32 to vector<8x1xf32>
    %20 = arith.addf %17, %19 : vector<8x1xf32>
    %21 = arith.negf %20 : vector<8x1xf32>
    %22 = math.exp %21 : vector<8x1xf32>
    %cst_13 = arith.constant 1.000000e+00 : f32
    %23 = vector.broadcast %cst_13 : f32 to vector<8x1xf32>
    %24 = arith.addf %23, %22 : vector<8x1xf32>
    %25 = arith.divf %23, %24 : vector<8x1xf32>
    %c0_14 = arith.constant 0 : index
    %c0_15 = arith.constant 0 : index
    %26 = vector.load %arg7[%c0_14, %c0_15] : memref<8x1xf32, #tpu.memory_space<vmem>>, vector<8x1xf32>
    tpu.vector_store %arg7[%c0_14, %c0_15], %25 {strides = array<i32>} : memref<8x1xf32, #tpu.memory_space<vmem>>, vector<8x1xf32>,
    return
  }
  func.func @transform_0(%arg0: i32) -> (i32, i32) {
    %c0_i32 = arith.constant 0 : i32
    %c0_i32_0 = arith.constant 0 : i32
    return %arg0, %c0_i32 : i32, i32
  }
  func.func @transform_1(%arg0: i32) -> (i32, i32) {
    %c0_i32 = arith.constant 0 : i32
    %c0_i32_0 = arith.constant 0 : i32
    %c0_i32_1 = arith.constant 0 : i32
    return %c0_i32, %c0_i32_0 : i32, i32
  }
  func.func @transform_2(%arg0: i32) -> (i32, i32) {
    %c0_i32 = arith.constant 0 : i32
    %c0_i32_0 = arith.constant 0 : i32
    %c0_i32_1 = arith.constant 0 : i32
    return %c0_i32, %c0_i32_0 : i32, i32
  }
  func.func @transform_3(%arg0: i32) -> (i32, i32) {
    %c0_i32 = arith.constant 0 : i32
    %c0_i32_0 = arith.constant 0 : i32
    %c0_i32_1 = arith.constant 0 : i32
    return %c0_i32, %c0_i32_0 : i32, i32
  }
  func.func @transform_4(%arg0: i32) -> (i32, i32) {
    %c0_i32 = arith.constant 0 : i32
    %c0_i32_0 = arith.constant 0 : i32
    %c0_i32_1 = arith.constant 0 : i32
    return %c0_i32, %c0_i32_0 : i32, i32
  }
  func.func @transform_5(%arg0: i32) -> (i32, i32) {
    %c0_i32 = arith.constant 0 : i32
    %c0_i32_0 = arith.constant 0 : i32
    %c0_i32_1 = arith.constant 0 : i32
    return %c0_i32, %c0_i32_0 : i32, i32
  }
  func.func @transform_6(%arg0: i32) -> (i32, i32) {
    %c0_i32 = arith.constant 0 : i32
    %c0_i32_0 = arith.constant 0 : i32
    return %arg0, %c0_i32 : i32, i32
  }
}

</mosaic_0001>

<bundles_post_ra>
// kernel: deep_crossing_forward.1
= control target key start
LH: loop header
LB: loop body
LE: loop exit
PB: predicated region body
PF: predicated region fallthrough
CT: control target
= control target key end

     0   :  { %vm143_vm3 = vcmask 7168   ;;  %s274_s1 = inlined_call_operand.vmem [shape: bf16[128,128], index: 1, kind: input, shape index: {}]   ;;  %s275_s2 = inlined_call_operand.vmem [shape: f32[1,128], index: 2, kind: input, shape index: {}]   ;;  %s276_s0 = inlined_call_operand.vmem [shape: bf16[8,128], index: 0, kind: input, shape index: {}]   ;;  %s277_s3 = inlined_call_operand.vmem [shape: f32[1,128], index: 3, kind: input, shape index: {}]   ;;  %s278_s4 = inlined_call_operand.vmem [shape: f32[1,128], index: 4, kind: input, shape index: {}]   ;;  %s279_s5 = inlined_call_operand.<no memory space> [shape: f32[1,1], index: 5, kind: input, shape index: {}]   ;;  %s280_s6 = inlined_call_operand.vmem [shape: f32[8,1], index: 6, kind: output, shape index: {}]  }
   0x1   :  { %v189_v0 = vld [vmem:[%s274_s1 + $0x38] sm:$0xff]  ;;  %v188_v1 = vld [vmem:[%s274_s1 + $0x30] sm:$0xff]  ;;  %v187_v2 = vld [vmem:[%s274_s1 + $0x28] sm:$0xff]  ;;  %v122_v20 = vstv %s279_s5 }
   0x2   :  { %93 = vmatpush.bf16.msra.mxu0 %v189_v0  ;;  %v186_v3 = vld [vmem:[%s274_s1 + $0x20] sm:$0xff]  ;;  %v185_v4 = vld [vmem:[%s274_s1 + $0x18] sm:$0xff]  ;;  %v184_v5 = vld [vmem:[%s274_s1 + $0x10] sm:$0xff] }
   0x3   :  { %v183_v6 = vld [vmem:[%s274_s1 + $0x8] sm:$0xff]  ;;  %v182_v7 = vld [vmem:[%s274_s1] sm:$0xff] }
   0x4   :  { %v24_v8 = vld [vmem:[%s276_s0] sm:$0xf] }
   0x5   :  { %v190_v9 = vld [vmem:[%s275_s2] ss:$0 sm:$0xff]  ;;  %v108_v10 = vunpack.c.l.bf16 %v24_v8 }
   0x6   :  { %94 = vmatpush.bf16.msra.mxu0 %v188_v1  ;;  %v191_v11 = vld [vmem:[%s277_s3] ss:$0 sm:$0xff] }
   0x7   :  { %v192_v14 = vld [vmem:[%s278_s4] ss:$0 sm:$0xff]  ;;  %v112_v16 = vmul.f32 %v191_v11, %v108_v10 }
   0xa   :  { %95 = vmatpush.bf16.msra.mxu0 %v187_v2 }
   0xe   :  { %96 = vmatpush.bf16.msra.mxu0 %v186_v3 }
  0x12   :  { %97 = vmatpush.bf16.msra.mxu0 %v185_v4 }
  0x16   :  { %98 = vmatpush.bf16.msra.mxu0 %v184_v5 }
  0x1a   :  { %99 = vmatpush.bf16.msra.mxu0 %v183_v6 }
  0x1e   :  { %100 = vmatpush.bf16.msra.mxu0 %v182_v7 }
  0x21   :  { %101 = vmatmul.bf16.vlgmr.msra.gmra.mxu0 %v24_v8 }
  0x9e   :  { %v102_v12 = vpop.f32.mrf.mxu0 }
  0x9f   :  { %v103_v13 = vadd.f32 %v190_v9, %v102_v12 }
  0xa1   :  { %v106_v15 = vmax.f32 %v103_v13, 0.0 }
  0xa3   :  { %v117_v17 = vmul.f32 %v192_v14, %v106_v15 }
  0xa5   :  { %v118_v18 = vadd.f32 %v117_v17, %v112_v16 }
  0xa6   :  { %v104_v19 = vpop.f32.mrf.mxu0 }
  0xa7   :  { %119 = vadd.xlane.f32.xlu0 %v118_v18 }
 0x11a   :  { %v120_v21 = vpop.xlane.xlu0 %119 }
 0x11b   :  { %v123_v22 = vadd.f32 %v122_v20, %v120_v21 }
 0x11d   :  { %v181_v23 = vmul.f32 -1.442695, %v123_v22 }
 0x11f   :  { %193 = vpow2.f32 %v181_v23 }
 0x125   :  { %v194_v24 = vpop.eup %193 }
 0x126   :  { %v127_v25 = vadd.f32 1.0, %v194_v24 }
 0x128   :  { %195 = vrcp.f32 %v127_v25  ;;  %v139_v29 = vand.u32 2147483648, %v127_v25  ;;  %v137_v31 = vand.u32 2147483647, %v127_v25  ;;  %vm133_vm1 = vweird.f32 %v127_v25 }
 0x12a   :  { %v140_v33 = vor.u32 1.1754944e-38, %v139_v29  ;;  %vm138_vm4 = vcmp.eq.f32.partialorder %v137_v31, 8.507059e+37 }
 0x12e   :  { %v196_v26 = vpop.eup %195 }
 0x12f   :  { %v129_v27 = vmul.f32 %v196_v26, %v127_v25  ;;  %vm134_vm0 = vweird.f32 %v196_v26 }
 0x130   :  { %vm135_vm2 = vmor %vm133_vm1, %vm134_vm0 }
 0x131   :  { %v130_v28 = vsub.f32 1.0, %v129_v27 }
 0x133   :  { %v131_v30 = vmul.f32 %v196_v26, %v130_v28 }
 0x135   :  { %v132_v32 = vadd.f32 %v196_v26, %v131_v30 }
 0x137   :  { %v136_v34 = vsel %vm135_vm2, %v196_v26, %v132_v32 }
 0x138   :  { %v141_v35 = vsel %vm138_vm4, %v140_v33, %v136_v34 }
 0x139   :  { %144 = vst.msk [vmem:[%s280_s6] sm:$0xff] %vm143_vm3, %v141_v35 }

</bundles_post_ra>
